<compile_context>
chip_gen: v6e
topology: v6e:2x2x1
jax: 0.10.0
libtpu: 0.0.40
codegen_flags: <defaults>
</compile_context>

<pallas_src>
import functools

import jax
import jax.numpy as jnp
from jax.experimental import pallas as pl
from jax.experimental.pallas import tpu as pltpu

LABEL_SMOOTHING = 0.1


def _largest_divisor_leq(n, cap):
    cap = max(1, min(n, cap))
    for d in range(cap, 0, -1):
        if n % d == 0:
            return d
    return 1


def _smooth_ce_kernel(x_ref, lbl_ref, out_ref, *, eps, hw, tile_hw, need_mask):
    """Per grid step: write partial sum of
       lse(x) - sum_k w_k * x_k,  w_k = eps/C + (1-eps)*[k == label]
    over the pixels of this block into a (8,128) output tile (value at [0,0])."""
    x = x_ref[...].astype(jnp.float32)      # (nb, C, T): classes on sublanes, pixels on lanes
    lbl = lbl_ref[...]                      # (nb, 1, T) int32 class id per pixel
    nb, c, t = x.shape

    # Numerically stable logsumexp over the class axis (sublane/XLU reduce).
    m = jnp.max(x, axis=1, keepdims=True)                                  # (nb,1,T)
    lse = m + jnp.log(jnp.sum(jnp.exp(x - m), axis=1, keepdims=True))      # (nb,1,T)

    # Fused label-pick + uniform-smoothing term: single weighted class reduce.
    cls = jax.lax.broadcasted_iota(jnp.int32, (nb, c, t), 1)               # (nb,C,T)
    w_hit = 1.0 - eps + eps / float(c)
    w_miss = eps / float(c)
    wgt = jnp.where(cls == lbl, w_hit, w_miss)                             # (nb,C,T)
    nll = lse - jnp.sum(wgt * x, axis=1, keepdims=True)                    # (nb,1,T)

    if need_mask:
        # Ragged tail of the pixel axis: select-style mask (discards NaN/Inf
        # computed from out-of-bounds lanes) BEFORE any accumulation.
        j = pl.program_id(1)
        col = j * tile_hw + jax.lax.broadcasted_iota(jnp.int32, (nb, 1, t), 2)
        nll = jnp.where(col < hw, nll, 0.0)

    partial = jnp.sum(nll)                                                 # scalar f32
    # Full (8,128) tile written every step (no stale VMEM): partial at [0,0].
    row = jax.lax.broadcasted_iota(jnp.int32, (8, 128), 0)
    lane = jax.lax.broadcasted_iota(jnp.int32, (8, 128), 1)
    out_ref[...] = jnp.where((row == 0) & (lane == 0), partial, 0.0)


def smooth_cross_entropy_loss(logits_nchw, targets_nhw, *, eps=LABEL_SMOOTHING,
                              max_block_bytes=2 * 1024 * 1024):
    """logits: (N, C, H, W) float; targets: (N, H, W) int class ids.
    Returns scalar mean label-smoothed cross-entropy (float32)."""
    n, c, h, w = logits_nchw.shape
    hw = h * w
    itemsize = jnp.dtype(logits_nchw.dtype).itemsize

    # Free views: NCHW -> (N, C, HW); labels -> (N, 1, HW). No transpose, no
    # dense target distribution, no padding copies, no f32 pre-cast.
    x = logits_nchw.reshape(n, c, hw)
    lbl = targets_nhw.reshape(n, 1, hw).astype(jnp.int32)

    # Adaptive tile: aim for ~max_block_bytes of logits per block so double-
    # buffered VMEM use (2x logits + 2x labels + out tiles ~ 2.5x this) stays
    # under every generation's default scoped-VMEM limit (16 MiB on v5e).
    bytes_per_pixel = c * itemsize
    pix_target = max_block_bytes // bytes_per_pixel

    if hw <= pix_target:
        # Small image: full pixel extent, pack several batch rows per block.
        tile_hw = hw
        nb_cap = max(1, max_block_bytes // max(1, hw * bytes_per_pixel))
        nb = _largest_divisor_leq(n, nb_cap)
    else:
        nb = 1
        tile_hw = min(hw, max(128, (pix_target // 128) * 128))

    grid = (n // nb, pl.cdiv(hw, tile_hw))
    need_mask = (hw % tile_hw) != 0   # static: aligned path carries no mask code

    kernel = functools.partial(_smooth_ce_kernel, eps=float(eps), hw=hw,
                               tile_hw=tile_hw, need_mask=need_mask)

    cost = pl.CostEstimate(
        flops=6 * n * hw * c,
        transcendentals=n * hw * (c + 1),
        bytes_accessed=n * hw * c * itemsize + n * hw * 4
                       + grid[0] * grid[1] * 8 * 128 * 4,
    )

    partials = pl.pallas_call(
        kernel,
        out_shape=jax.ShapeDtypeStruct((grid[0] * 8, grid[1] * 128), jnp.float32),
        grid_spec=pltpu.PrefetchScalarGridSpec(
            num_scalar_prefetch=0,
            grid=grid,
            in_specs=[
                pl.BlockSpec((nb, c, tile_hw), lambda i, j: (i, 0, j)),
                pl.BlockSpec((nb, 1, tile_hw), lambda i, j: (i, 0, j)),
            ],
            out_specs=pl.BlockSpec((8, 128), lambda i, j: (i, j)),
        ),
        compiler_params=pltpu.CompilerParams(
            # No carried state: both axes parallel -> v7x uses both TensorCores.
            dimension_semantics=("parallel", "parallel"),
        ),
        cost_estimate=cost,
    )(x, lbl)

    # Tiny final reduction + mean in plain XLA.
    return jnp.sum(partials) / jnp.float32(n * hw)


def _reference(logits_nchw, targets_nhw, eps=LABEL_SMOOTHING):
    n, c, h, w = logits_nchw.shape
    xf = jnp.transpose(logits_nchw, (0, 2, 3, 1)).reshape(-1, c).astype(jnp.float32)
    onehot = jax.nn.one_hot(targets_nhw.reshape(-1), c, dtype=jnp.float32)
    q = (1.0 - eps) * onehot + eps / c
    logp = jax.nn.log_softmax(xf, axis=-1)
    return jnp.mean(-jnp.sum(q * logp, axis=-1))


if __name__ == "__main__":
    key = jax.random.PRNGKey(0)
    k1, k2, k3, k4 = jax.random.split(key, 4)

    # Test 1: small image, batch rows packed into one block (nb=2, grid (1,1)).
    N, C, H, W = 2, 4, 16, 16
    logits = jax.random.normal(k1, (N, C, H, W), dtype=jnp.float32)
    targets = jax.random.randint(k2, (N, H, W), 0, C, dtype=jnp.int32)
    loss = jax.block_until_ready(smooth_cross_entropy_loss(logits, targets))
    ref = _reference(logits, targets)
    assert jnp.allclose(loss, ref, rtol=1e-5, atol=1e-5), (loss, ref)

    # Test 2: force pixel tiling + ragged tail (tile_hw=256, hw=576) by
    # shrinking the block-byte target; exercises the masked path.
    N2, C2, H2, W2 = 2, 4, 24, 24
    logits2 = jax.random.normal(k3, (N2, C2, H2, W2), dtype=jnp.float32)
    targets2 = jax.random.randint(k4, (N2, H2, W2), 0, C2, dtype=jnp.int32)
    loss2 = jax.block_until_ready(
        smooth_cross_entropy_loss(logits2, targets2, max_block_bytes=4096))
    ref2 = _reference(logits2, targets2)
    assert jnp.allclose(loss2, ref2, rtol=1e-5, atol=1e-5), (loss2, ref2)

    print("KERNEL_OK")
</pallas_src>

<mosaic_0001>
module attributes {stable_mosaic.version = 11 : i64} {
  func.func @_smooth_ce_kernel(%arg0: i32, %arg1: i32, %arg2: memref<2x4x256xf32, #tpu.memory_space<vmem>>, %arg3: memref<2x1x256xi32, #tpu.memory_space<vmem>>, %arg4: memref<8x128xf32, #tpu.memory_space<vmem>>) attributes {dimension_semantics = [#tpu.dimension_semantics<parallel>, #tpu.dimension_semantics<parallel>], iteration_bounds = array<i64: 1, 1>, scalar_prefetch = 0 : i64, scratch_operands = 0 : i64, tpu.core_type = #tpu.core_type<tc>, window_params = [{transform_indices = @transform_0, window_bounds = array<i64: 2, 4, 256>}, {transform_indices = @transform_1, window_bounds = array<i64: 2, 1, 256>}, {transform_indices = @transform_2, window_bounds = array<i64: 8, 128>}]} {
    %c0 = arith.constant 0 : index
    %c0_0 = arith.constant 0 : index
    %c0_1 = arith.constant 0 : index
    %0 = vector.load %arg2[%c0, %c0_0, %c0_1] : memref<2x4x256xf32, #tpu.memory_space<vmem>>, vector<2x4x256xf32>
    %c0_2 = arith.constant 0 : index
    %c0_3 = arith.constant 0 : index
    %c0_4 = arith.constant 0 : index
    %1 = vector.load %arg3[%c0_2, %c0_3, %c0_4] : memref<2x1x256xi32, #tpu.memory_space<vmem>>, vector<2x1x256xi32>
    %cst = arith.constant dense<0xFF800000> : vector<2x256xf32>
    %2 = vector.multi_reduction <maximumf>, %0, %cst [1] : vector<2x4x256xf32> to vector<2x256xf32>
    %3 = vector.shape_cast %2 : vector<2x256xf32> to vector<2x1x256xf32>
    %4 = vector.broadcast %3 : vector<2x1x256xf32> to vector<2x4x256xf32>
    %5 = arith.subf %0, %4 : vector<2x4x256xf32>
    %6 = math.exp %5 : vector<2x4x256xf32>
    %cst_5 = arith.constant dense<0.000000e+00> : vector<2x256xf32>
    %7 = vector.multi_reduction <add>, %6, %cst_5 [1] : vector<2x4x256xf32> to vector<2x256xf32>
    %8 = vector.shape_cast %7 : vector<2x256xf32> to vector<2x1x256xf32>
    %9 = math.log %8 : vector<2x1x256xf32>
    %10 = arith.addf %3, %9 : vector<2x1x256xf32>
    %11 = tpu.iota {dimensions = array<i32: 1>} : vector<2x4x256xi32>
    %12 = vector.broadcast %1 : vector<2x1x256xi32> to vector<2x4x256xi32>
    %13 = arith.cmpi eq, %11, %12 : vector<2x4x256xi32>
    %cst_6 = arith.constant 9.250000e-01 : f32
    %cst_7 = arith.constant 2.500000e-02 : f32
    %14 = vector.broadcast %cst_6 : f32 to vector<2x4x256xf32>
    %15 = vector.broadcast %cst_7 : f32 to vector<2x4x256xf32>
    %16 = arith.select %13, %14, %15 : vector<2x4x256xi1>, vector<2x4x256xf32>
    %17 = arith.mulf %16, %0 : vector<2x4x256xf32>
    %cst_8 = arith.constant dense<0.000000e+00> : vector<2x256xf32>
    %18 = vector.multi_reduction <add>, %17, %cst_8 [1] : vector<2x4x256xf32> to vector<2x256xf32>
    %19 = vector.shape_cast %18 : vector<2x256xf32> to vector<2x1x256xf32>
    %20 = arith.subf %10, %19 : vector<2x1x256xf32>
    %21 = vector.shape_cast %20 : vector<2x1x256xf32> to vector<1x2x1x256xf32>
    %cst_9 = arith.constant dense<0.000000e+00> : vector<1xf32>
    %22 = vector.multi_reduction <add>, %21, %cst_9 [1, 2, 3] : vector<1x2x1x256xf32> to vector<1xf32>
    %23 = vector.shape_cast %22 : vector<1xf32> to vector<1x1x1x1xf32>
    %24 = vector.extract %23[0, 0, 0, 0] : f32 from vector<1x1x1x1xf32>
    %25 = tpu.iota {dimensions = array<i32: 0>} : vector<8x128xi32>
    %26 = tpu.iota {dimensions = array<i32: 1>} : vector<8x128xi32>
    %c0_i32 = arith.constant 0 : i32
    %27 = vector.broadcast %c0_i32 : i32 to vector<8x128xi32>
    %28 = arith.cmpi eq, %25, %27 : vector<8x128xi32>
    %c0_i32_10 = arith.constant 0 : i32
    %29 = vector.broadcast %c0_i32_10 : i32 to vector<8x128xi32>
    %30 = arith.cmpi eq, %26, %29 : vector<8x128xi32>
    %31 = arith.andi %28, %30 : vector<8x128xi1>
    %cst_11 = arith.constant 0.000000e+00 : f32
    %32 = vector.broadcast %24 : f32 to vector<8x128xf32>
    %33 = vector.broadcast %cst_11 : f32 to vector<8x128xf32>
    %34 = arith.select %31, %32, %33 : vector<8x128xi1>, vector<8x128xf32>
    %c0_12 = arith.constant 0 : index
    %c0_13 = arith.constant 0 : index
    %35 = vector.load %arg4[%c0_12, %c0_13] : memref<8x128xf32, #tpu.memory_space<vmem>>, vector<8x128xf32>
    tpu.vector_store %arg4[%c0_12, %c0_13], %34 {strides = array<i32>} : memref<8x128xf32, #tpu.memory_space<vmem>>, vector<8x128xf32>,
    return
  }
  func.func @transform_0(%arg0: i32, %arg1: i32) -> (i32, i32, i32) {
    %c0_i32 = arith.constant 0 : i32
    %c0_i32_0 = arith.constant 0 : i32
    return %arg0, %c0_i32, %arg1 : i32, i32, i32
  }
  func.func @transform_1(%arg0: i32, %arg1: i32) -> (i32, i32, i32) {
    %c0_i32 = arith.constant 0 : i32
    %c0_i32_0 = arith.constant 0 : i32
    return %arg0, %c0_i32, %arg1 : i32, i32, i32
  }
  func.func @transform_2(%arg0: i32, %arg1: i32) -> (i32, i32) {
    %c0_i32 = arith.constant 0 : i32
    return %arg0, %arg1 : i32, i32
  }
}

</mosaic_0001>

<bundles_post_ra>
// kernel: tpu_custom_call.1
= control target key start
LH: loop header
LB: loop body
LE: loop exit
PB: predicated region body
PF: predicated region fallthrough
CT: control target
= control target key end

     0   :  { %7 = vsyncpa [#allocation3], 0  ;;  %s425_s0 = inlined_call_operand.hbm [shape: f32[2,4,256], index: 0, kind: input, shape index: {}]   ;;  %s426_s1 = inlined_call_operand.hbm [shape: s32[2,1,256], index: 1, kind: input, shape index: {}]   ;;  %s427_s2 = inlined_call_operand.hbm [shape: f32[8,128], index: 2, kind: output, shape index: {}]  }
   0x1   :  { %8 = vsyncpa [#allocation6], 0 }
   0x2   :  { %9 = vsyncpa [#allocation4], 0  ;;  %s332_s9 = smov [#allocation2]  }
   0x3   :  { %s15_s10 = sshll.u32 %s332_s9, 4  ;;  %s16_s10 = int_to_ptr.vmem [resolvable:$true] %s15_s10 }
   0x4   :  { %s274_s11 = scalar_lea.vmem %s16_s10, 256  ;;  %p279_p1 = scmp.lt.s32.totalorder %s16_s10, %s16_s10 }
   0x5   :  { %p275_p0 = scmp.ne.s32.totalorder %s16_s10, %s274_s11  ;;  %p280_p2 = scmp.lt.s32.totalorder %s274_s11, %s274_s11 }
   0x7   :  { %p281_p3 = por %p280_p2, %p279_p1 }
   0x9   :  { %p282_p4 = pnand %p281_p3, %p275_p0 }
   0xb   :  { %285 = shalt.err (!%p282_p4)
}
   0xc   :  { %s333_s12 = smov 128   ;;  %s334_s13 = smov 8  }
   0xd   :  { %21 = dma.hbm_to_vmem [thread:$0]  %s425_s0, 256, %s16_s10, [#allocation3], %s333_s12, %s333_s12, %s334_s13  }
   0xe   :  { %s335_s16 = smov [#allocation5]  }
   0xf   :  { %s27_s17 = sshll.u32 %s335_s16, 4  ;;  %s28_s17 = int_to_ptr.vmem [resolvable:$true] %s27_s17 }
  0x10   :  { %s294_s18 = scalar_lea.vmem %s28_s17, 64  ;;  %p299_p6 = scmp.lt.s32.totalorder %s28_s17, %s28_s17 }
  0x11   :  { %p295_p5 = scmp.ne.s32.totalorder %s28_s17, %s294_s18  ;;  %p300_p7 = scmp.lt.s32.totalorder %s294_s18, %s294_s18 }
  0x13   :  { %p301_p8 = por %p300_p7, %p299_p6 }
  0x15   :  { %p302_p9 = pnand %p301_p8, %p295_p5 }
  0x17   :  { %305 = shalt.err (!%p302_p9)
}
  0x18   :  { %s336_s19 = smov 32   ;;  %s337_s20 = smov 2  }
  0x19   :  { %33 = dma.hbm_to_vmem [thread:$0]  %s426_s1, 64, %s28_s17, [#allocation6], %s336_s19, %s336_s19, %s337_s20  }
  0x1a   :  { %326 = dma.done.wait [#allocation3], 256  }
  0x1b   :  { %327 = vsyncadd [#allocation3], 4294967040 }
  0x1c   :  { %328 = dma.done.wait [#allocation6], 64  }
  0x1d   :  { %329 = vsyncadd [#allocation6], 4294967232  ;;  %vm50_vm0 = vcmask 1043456   ;;  %v361_v0 = vld [vmem:[#allocation2] sm:$0xff]  ;;  %v363_v1 = vld [vmem:[#allocation2 + $0x8] sm:$0xff]  ;;  %v139_v32 = vlaneseq  ;;  %vm201_vm5 = vcmask 1040384  }
  0x1e   :  { %v367_v2 = vcombine.high %v361_v0, %v361_v0  ;;  %v371_v3 = vcombine.high %v363_v1, %v363_v1  ;;  %v51_v4 = vsel %vm50_vm0, %v361_v0, -inf  ;;  %v65_v5 = vsel %vm50_vm0, %v363_v1, -inf  ;;  %v42_v41 = vld [vmem:[#allocation5] sm:$0x3]  ;;  %v43_v42 = vld [vmem:[#allocation5 + $0x2] sm:$0x3] }
  0x1f   :  { %v52_v6 = vrot.slane %v51_v4, 4  ;;  %v66_v7 = vrot.slane %v65_v5, 4  ;;  %v396_v37 = vshrl.u32 %v139_v32, 7  ;;  %v338_v48 = vmov 0.025   ;;  %s339_s0 = smov [#allocation7]  }
  0x20   :  { %v58_v8 = vsel %vm50_vm0, %v367_v2, -inf  ;;  %v72_v9 = vsel %vm50_vm0, %v371_v3, -inf  ;;  %s232_s1 = sshll.u32 %s339_s0, 4  ;;  %s233_s1 = int_to_ptr.vmem [resolvable:$true] %s232_s1 }
  0x21   :  { %v53_v10 = vmax.f32 %v51_v4, %v52_v6  ;;  %v59_v11 = vrot.slane %v58_v8, 4  ;;  %v67_v12 = vmax.f32 %v65_v5, %v66_v7  ;;  %v73_v13 = vrot.slane %v72_v9, 4  ;;  %s306_s24 = scalar_lea.vmem %s233_s1, 128  ;;  %p311_p11 = scmp.lt.s32.totalorder %s233_s1, %s233_s1 }
  0x22   :  { %v143_v40 = vsub.s32 0, %v396_v37  ;;  %v147_v43 = vsub.s32 1, %v396_v37  ;;  %vm220_vm6 = vcmp.eq.s32.totalorder %v396_v37, 0  ;;  %p307_p10 = scmp.ne.s32.totalorder %s233_s1, %s306_s24  ;;  %p312_p12 = scmp.lt.s32.totalorder %s306_s24, %s306_s24 }
  0x23   :  { %v54_v14 = vrot.slane %v53_v10, 2  ;;  %v60_v15 = vmax.f32 %v58_v8, %v59_v11  ;;  %v68_v16 = vrot.slane %v67_v12, 2  ;;  %v74_v17 = vmax.f32 %v72_v9, %v73_v13 }
  0x24   :  { %v144_v44 = vrot.slane %v42_v41, %v143_v40  ;;  %v152_v45 = vrot.slane %v43_v42, %v143_v40  ;;  %v148_v46 = vrot.slane %v42_v41, %v147_v43  ;;  %v156_v47 = vrot.slane %v43_v42, %v147_v43  ;;  %p313_p13 = por %p312_p12, %p311_p11 }
  0x25   :  { %v55_v18 = vmax.f32 %v53_v10, %v54_v14  ;;  %v61_v19 = vrot.slane %v60_v15, 2  ;;  %v69_v20 = vmax.f32 %v67_v12, %v68_v16  ;;  %v75_v21 = vrot.slane %v74_v17, 2 }
  0x26   :  { %vm157_vm1 = vcmp.eq.s32.totalorder %v396_v37, %v144_v44  ;;  %vm159_vm2 = vcmp.eq.s32.totalorder %v396_v37, %v152_v45  ;;  %vm158_vm3 = vcmp.eq.s32.totalorder %v396_v37, %v148_v46  ;;  %vm160_vm4 = vcmp.eq.s32.totalorder %v396_v37, %v156_v47  ;;  %p314_p0 = pnand %p313_p13, %p307_p10 }
  0x27   :  { %v56_v22 = vrot.slane %v55_v18, 1  ;;  %v62_v23 = vmax.f32 %v60_v15, %v61_v19  ;;  %v70_v24 = vrot.slane %v69_v20, 1  ;;  %v76_v25 = vmax.f32 %v74_v17, %v75_v21 }
  0x28   :  { %v161_v49 = vsel %vm157_vm1, 0.925, %v338_v48  ;;  %v163_v50 = vsel %vm159_vm2, 0.925, %v338_v48  ;;  %v162_v52 = vsel %vm158_vm3, 0.925, %v338_v48 }
  0x29   :  { %v381_v26 = vmax.f32 %v55_v18, %v56_v22  ;;  %v63_v27 = vrot.slane %v62_v23, 1  ;;  %v383_v28 = vmax.f32 %v69_v20, %v70_v24  ;;  %v77_v29 = vrot.slane %v76_v25, 1 }
  0x2a   :  { %v164_v56 = vsel %vm160_vm4, 0.925, %v338_v48  ;;  %v165_v57 = vmul.f32 %v161_v49, %v361_v0  ;;  %v167_v61 = vmul.f32 %v163_v50, %v363_v1  ;;  %v166_v4 = vmul.f32 %v162_v52, %v367_v2 }
  0x2b   :  { %v385_v30 = vmax.f32 %v62_v23, %v63_v27  ;;  %v387_v31 = vmax.f32 %v76_v25, %v77_v29  ;;  %v168_v8 = vmul.f32 %v164_v56, %v371_v3 }
  0x2c   :  { %v183_v13 = vsel %vm50_vm0, %v167_v61, 0.0  ;;  %v176_v15 = vsel %vm50_vm0, %v166_v4, 0.0 }
  0x2d   :  { %v83_v33 = vcombine.low %v381_v26, %v385_v30  ;;  %v84_v34 = vcombine.low %v383_v28, %v387_v31  ;;  %v190_v18 = vsel %vm50_vm0, %v168_v8, 0.0  ;;  %v184_v3 = vrot.slane %v183_v13, 4 }
  0x2e   :  { %v177_v23 = vrot.slane %v176_v15, 4  ;;  %v191_v27 = vrot.slane %v190_v18, 4 }
  0x2f   :  { %v87_v35 = vsub.f32 %v361_v0, %v83_v33  ;;  %v88_v36 = vsub.f32 %v363_v1, %v84_v34  ;;  %v169_v0 = vsel %vm50_vm0, %v165_v57, 0.0 }
  0x30   :  { %v170_v17 = vrot.slane %v169_v0, 4  ;;  %v178_v40 = vadd.f32 %v177_v23, %v176_v15  ;;  %v192_v42 = vadd.f32 %v191_v27, %v190_v18 }
  0x31   :  { %v89_v38 = vmul.f32 1.442695, %v87_v35  ;;  %v91_v39 = vmul.f32 1.442695, %v88_v36 }
  0x32   :  { %v171_v34 = vadd.f32 %v170_v17, %v169_v0  ;;  %v179_v45 = vrot.slane %v178_v40, 2  ;;  %v193_v46 = vrot.slane %v192_v42, 2 }
  0x33   :  { %254 = vpow2.f32 %v89_v38  ;;  %v185_v38 = vadd.f32 %v184_v3, %v183_v13 }
  0x34   :  { %256 = vpow2.f32 %v91_v39  ;;  %v172_v43 = vrot.slane %v171_v34, 2  ;;  %v180_v49 = vadd.f32 %v179_v45, %v178_v40  ;;  %v194_v50 = vadd.f32 %v193_v46, %v192_v42 }
  0x35   :  { %v186_v44 = vrot.slane %v185_v38, 2 }
  0x36   :  { %v173_v47 = vadd.f32 %v172_v43, %v171_v34 }
  0x37   :  { %v187_v48 = vadd.f32 %v186_v44, %v185_v38 }
  0x39   :  { %v188_v52 = vrot.slane %v187_v48, 1 }
  0x3b   :  { %v189_v61 = vadd.f32 %v188_v52, %v187_v48 }
  0x40   :  { %v255_v51 = vpop.eup %254 }
  0x41   :  { %v257_v53 = vpop.eup %256  ;;  %v95_v54 = vcombine.high %v255_v51, %v255_v51  ;;  %v99_v55 = vsel %vm50_vm0, %v255_v51, 0.0  ;;  %v174_v51 = vrot.slane %v173_v47, 1 }
  0x42   :  { %v96_v58 = vcombine.high %v257_v53, %v257_v53  ;;  %v100_v59 = vrot.slane %v99_v55, 4  ;;  %v113_v60 = vsel %vm50_vm0, %v257_v53, 0.0  ;;  %v181_v53 = vrot.slane %v180_v49, 1 }
  0x43   :  { %v106_v62 = vsel %vm50_vm0, %v95_v54, 0.0  ;;  %v114_v63 = vrot.slane %v113_v60, 4 }
  0x44   :  { %v101_v5 = vadd.f32 %v100_v59, %v99_v55  ;;  %v107_v6 = vrot.slane %v106_v62, 4  ;;  %v120_v7 = vsel %vm50_vm0, %v96_v58, 0.0  ;;  %v195_v55 = vrot.slane %v194_v50, 1 }
  0x45   :  { %v115_v9 = vadd.f32 %v114_v63, %v113_v60  ;;  %v121_v10 = vrot.slane %v120_v7, 4  ;;  %v175_v58 = vadd.f32 %v174_v51, %v173_v47 }
  0x46   :  { %v102_v11 = vrot.slane %v101_v5, 2  ;;  %v108_v12 = vadd.f32 %v107_v6, %v106_v62  ;;  %v196_v8 = vadd.f32 %v195_v55, %v194_v50 }
  0x47   :  { %v116_v1 = vrot.slane %v115_v9, 2  ;;  %v122_v14 = vadd.f32 %v121_v10, %v120_v7 }
  0x48   :  { %v103_v16 = vadd.f32 %v102_v11, %v101_v5  ;;  %v109_v2 = vrot.slane %v108_v12, 2  ;;  %v182_v5 = vadd.f32 %v181_v53, %v180_v49 }
  0x49   :  { %v117_v19 = vadd.f32 %v116_v1, %v115_v9  ;;  %v123_v20 = vrot.slane %v122_v14, 2 }
  0x4a   :  { %v104_v21 = vrot.slane %v103_v16, 1  ;;  %v110_v22 = vadd.f32 %v109_v2, %v108_v12 }
  0x4b   :  { %v118_v24 = vrot.slane %v117_v19, 1  ;;  %v124_v25 = vadd.f32 %v123_v20, %v122_v14 }
  0x4c   :  { %v105_v29 = vadd.f32 %v104_v21, %v103_v16  ;;  %v111_v33 = vrot.slane %v110_v22, 1 }
  0x4d   :  { %v119_v35 = vadd.f32 %v118_v24, %v117_v19  ;;  %v125_v36 = vrot.slane %v124_v25, 1 }
  0x4e   :  { %v112_v39 = vadd.f32 %v111_v33, %v110_v22  ;;  %258 = vlog2.f32 %v105_v29 }
  0x4f   :  { %v126_v41 = vadd.f32 %v125_v36, %v124_v25  ;;  %260 = vlog2.f32 %v119_v35 }
  0x50   :  { %262 = vlog2.f32 %v112_v39 }
  0x51   :  { %264 = vlog2.f32 %v126_v41 }
  0x5b   :  { %v259_v54 = vpop.eup %258 }
  0x5c   :  { %v261_v56 = vpop.eup %260  ;;  %v128_v57 = vmul.f32 0.6931472, %v259_v54 }
  0x5d   :  { %v263_v59 = vpop.eup %262  ;;  %v132_v60 = vmul.f32 0.6931472, %v261_v56 }
  0x5e   :  { %v265_v62 = vpop.eup %264  ;;  %v130_v63 = vmul.f32 0.6931472, %v263_v59  ;;  %v135_v4 = vadd.f32 %v128_v57, %v381_v26 }
  0x5f   :  { %v134_v6 = vmul.f32 0.6931472, %v265_v62  ;;  %v137_v7 = vadd.f32 %v132_v60, %v383_v28 }
  0x60   :  { %v136_v9 = vadd.f32 %v130_v63, %v385_v30  ;;  %v197_v10 = vsub.f32 %v135_v4, %v175_v58 }
  0x61   :  { %v138_v0 = vadd.f32 %v134_v6, %v387_v31  ;;  %v199_v11 = vsub.f32 %v137_v7, %v189_v61  ;;  %v219_v31 = vand.u32 127, %v139_v32 }
  0x62   :  { %v198_v12 = vsub.f32 %v136_v9, %v182_v5  ;;  %v202_v13 = vsel %vm201_vm5, %v197_v10, 0.0 }
  0x63   :  { %v200_v1 = vsub.f32 %v138_v0, %v196_v8  ;;  %v205_v15 = vsel %vm201_vm5, %v199_v11, 0.0  ;;  %vm221_vm7 = vcmp.eq.s32.totalorder %v219_v31, 0 }
  0x64   :  { %v203_v14 = vsel %vm201_vm5, %v198_v12, 0.0  ;;  %vm222_vm8 = vmand %vm220_vm6, %vm221_vm7 }
  0x65   :  { %v204_v16 = vadd.f32 %v203_v14, %v202_v13  ;;  %v207_v2 = vsel %vm201_vm5, %v200_v1, 0.0 }
  0x67   :  { %v206_v26 = vadd.f32 %v205_v15, %v204_v16 }
  0x69   :  { %v208_v17 = vadd.f32 %v207_v2, %v206_v26 }
  0x6b   :  { %209 = vadd.xlane.f32.xlu0 %v208_v17 }
  0xf4   :  { %v210_v18 = vpop.xlane.xlu0 %209 }
  0xf5   :  { %v211_v28 = vrot.slane %v210_v18, 4 }
  0xf7   :  { %v212_v19 = vadd.f32 %v211_v28, %v210_v18 }
  0xf9   :  { %v213_v20 = vrot.slane %v212_v19, 2 }
  0xfb   :  { %v214_v3 = vadd.f32 %v213_v20, %v212_v19 }
  0xfd   :  { %v215_v30 = vrot.slane %v214_v3, 1 }
  0xff   :  { %v216_v21 = vadd.f32 %v215_v30, %v214_v3 }
 0x101   :  { %242 = vpush %v216_v21 }
 0x132   :  { %s243_s23 = spop %242 }
 0x133   :  { %v223_v22 = vstv %s243_s23 }
 0x134   :  { %v224_v23 = vsel %vm222_vm8, %v223_v22, 0.0 }
 0x135   :  { %225 = vst [vmem:[#allocation7] sm:$0xff] %v224_v23 }
 0x136   :  { %317 = shalt.err (!%p314_p0)
}
 0x137   :  { %235 = dma.vmem_to_hbm [thread:$0]  %s233_s1, 128, %s427_s2, [#allocation4]  }
 0x138   :  { %330 = dma.done.wait [#allocation4], 128  }
 0x139   :  { %331 = vsyncadd [#allocation4], 4294967168 }
 0x13a   :  { %239 = vsyncpa [#allocation3], 1 }
 0x13b   :  { %240 = vsyncpa [#allocation6], 1 }
 0x13c   :  { %241 = vsyncpa [#allocation4], 1 }

</bundles_post_ra>
